<compile_context>
chip_gen: v7x
topology: tpu7x:2x2x1
jax: 0.10.0
libtpu: 0.0.40
codegen_flags: <defaults>
</compile_context>

<pallas_src>
import math
from functools import partial

import jax
import jax.numpy as jnp
from jax.experimental import pallas as pl
from jax.experimental.pallas import tpu as pltpu


_HEADS_W = 128   # lane-dense width of the fused heads output slab


# ----------------------------------------------------------------------------
# Pallas kernel: full T-step rollout of (LSTMCell -> policy/value -> lse)
# ----------------------------------------------------------------------------
def _lstm_rollout_kernel(x_ref, h0_ref, c0_ref,
                         wih_ref, whh_ref, bg_ref,
                         wheads_ref, bheads_ref,
                         heads_ref, h_out_ref, c_out_ref,
                         h_sc, c_sc, *, num_actions):
    t = pl.program_id(0)

    # Load the carried state into VMEM scratch on the first step only.
    @pl.when(t == 0)
    def _():
        h_sc[...] = h0_ref[...]
        c_sc[...] = c0_ref[...]

    x_t = x_ref[0]          # (B, I)
    h = h_sc[...]           # (B, H)
    c = c_sc[...]           # (B, H)
    H = h.shape[-1]

    # gates = x_t @ W_ih^T + h @ W_hh^T + (b_ih + b_hh)   -> (B, 4H)
    gates = (jnp.dot(x_t, wih_ref[...], preferred_element_type=jnp.float32)
             + jnp.dot(h, whh_ref[...], preferred_element_type=jnp.float32)
             + bg_ref[...])

    # Activations on the full (B, 4H) vreg (two EUP passes), then gate slices.
    # PyTorch LSTMCell gate order: [i | f | g | o].
    sig = jax.nn.sigmoid(gates)
    th = jnp.tanh(gates)
    i_g = sig[:, 0 * H:1 * H]
    f_g = sig[:, 1 * H:2 * H]
    g_g = th[:, 2 * H:3 * H]
    o_g = sig[:, 3 * H:4 * H]

    c_new = f_g * c + i_g * g_g
    h_new = o_g * jnp.tanh(c_new)
    h_sc[...] = h_new
    c_sc[...] = c_new

    # Fused heads: lanes [0, A) = policy logits, lane A = value, rest = 0.
    heads = (jnp.dot(h_new, wheads_ref[...], preferred_element_type=jnp.float32)
             + bheads_ref[...])                           # (B, 128)

    # Fused masked log-sum-exp over the A logit lanes; the scalar lands in
    # lane (A + 1) of the same lane-dense output slab.
    lane = jax.lax.broadcasted_iota(jnp.int32, heads.shape, 1)
    is_logit = lane < num_actions
    m = jnp.max(jnp.where(is_logit, heads, -jnp.inf), axis=-1, keepdims=True)
    p = jnp.exp(jnp.where(is_logit, heads - m, -jnp.inf))
    lse = m + jnp.log(jnp.sum(p, axis=-1, keepdims=True))
    heads_ref[0] = jnp.where(lane == num_actions + 1, lse, heads)

    # Final carried state written once (constant-index output blocks).
    @pl.when(t == pl.num_programs(0) - 1)
    def _():
        h_out_ref[...] = h_new
        c_out_ref[...] = c_new


def _round_up(x, m):
    return (x + m - 1) // m * m


def lstm_baseline_rollout(xs, h0, c0, params):
    """Run T LSTMBaseline forward steps in ONE Pallas kernel.

    xs: (T, B, input_size).  Returns (logits (T,B,A), values (T,B),
    log_probs (T,B,A), (h_T, c_T)).
    """
    T, B, I = xs.shape
    H = h0.shape[-1]
    A = int(params["num_actions"])
    assert A + 2 <= _HEADS_W
    f32 = jnp.float32

    # Pad batch to a multiple of 8 so every f32 vreg sublane / MXU row is used.
    B_pad = _round_up(max(B, 8), 8)
    if B_pad != B:
        xs_p = jnp.zeros((T, B_pad, I), f32).at[:, :B].set(xs)
        h0_p = jnp.zeros((B_pad, H), f32).at[:B].set(h0)
        c0_p = jnp.zeros((B_pad, H), f32).at[:B].set(c0)
    else:
        xs_p, h0_p, c0_p = xs, h0, c0

    kernel = partial(_lstm_rollout_kernel, num_actions=A)
    const = lambda t: (0, 0)   # resident (weights / biases / init state / final state)

    heads, h_T, c_T = pl.pallas_call(
        kernel,
        out_shape=(
            jax.ShapeDtypeStruct((T, B_pad, _HEADS_W), f32),   # per-step heads slab
            jax.ShapeDtypeStruct((B_pad, H), f32),             # final h
            jax.ShapeDtypeStruct((B_pad, H), f32),             # final c
        ),
        grid_spec=pltpu.PrefetchScalarGridSpec(
            num_scalar_prefetch=0,
            grid=(T,),
            in_specs=[
                pl.BlockSpec((1, B_pad, I), lambda t: (t, 0, 0)),   # x_t streamed
                pl.BlockSpec((B_pad, H), const),                    # h0
                pl.BlockSpec((B_pad, H), const),                    # c0
                pl.BlockSpec((I, 4 * H), const),                    # W_ih^T
                pl.BlockSpec((H, 4 * H), const),                    # W_hh^T
                pl.BlockSpec((1, 4 * H), const),                    # b_ih + b_hh
                pl.BlockSpec((H, _HEADS_W), const),                 # fused heads W^T
                pl.BlockSpec((1, _HEADS_W), const),                 # fused heads bias
            ],
            out_specs=(
                pl.BlockSpec((1, B_pad, _HEADS_W), lambda t: (t, 0, 0)),
                pl.BlockSpec((B_pad, H), const),
                pl.BlockSpec((B_pad, H), const),
            ),
            scratch_shapes=[
                pltpu.VMEM((B_pad, H), f32),   # h carried across grid steps
                pltpu.VMEM((B_pad, H), f32),   # c carried across grid steps
            ],
        ),
        compiler_params=pltpu.CompilerParams(
            dimension_semantics=("arbitrary",)),   # recurrence: sequential in time
    )(xs_p, h0_p, c0_p,
      params["w_ih_t"], params["w_hh_t"], params["b_gates"],
      params["w_heads_t"], params["b_heads"])

    logits = heads[:, :B, :A]
    values = heads[:, :B, A]
    lse = heads[:, :B, A + 1]
    log_probs = logits - lse[..., None]
    return logits, values, log_probs, (h_T[:B], c_T[:B])


def lstm_baseline_step(x, h, c, params):
    """One forward step (same semantics as LSTMBaseline.forward)."""
    logits, values, log_probs, new_state = lstm_baseline_rollout(x[None], h, c, params)
    return logits[0], values[0], log_probs[0], new_state


# ----------------------------------------------------------------------------
# Deterministic parameter init (mirrors LSTMBaseline._init_weights)
# ----------------------------------------------------------------------------
def _xavier_uniform(key, shape, fan_in, fan_out, gain=1.0):
    bound = gain * math.sqrt(6.0 / (fan_in + fan_out))
    return jax.random.uniform(key, shape, jnp.float32, -bound, bound)


def init_params(key, input_size, hidden_size, num_actions):
    k_ih, k_hh, k_pol, k_val = jax.random.split(key, 4)
    H, A = hidden_size, num_actions

    # LSTMCell weights: PyTorch stores (4H, in) / (4H, H); xavier_uniform uses
    # fan_in = columns, fan_out = rows.  We store the transposes.
    w_ih = _xavier_uniform(k_ih, (4 * H, input_size), input_size, 4 * H)
    w_hh = _xavier_uniform(k_hh, (4 * H, H), H, 4 * H)

    # Biases: zeros, forget-gate slice [H:2H] set to 1.0 on BOTH b_ih and b_hh
    # -> combined bias has 2.0 there.
    b = jnp.zeros((4 * H,), jnp.float32).at[H:2 * H].set(2.0)

    # Linear heads: xavier_uniform weights, zero bias.
    w_pol = _xavier_uniform(k_pol, (A, H), H, A)        # (A, H)
    w_val = _xavier_uniform(k_val, (1, H), H, 1)        # (1, H)

    # Fused, lane-dense heads weight/bias: col j<A = policy, col A = value, rest 0.
    w_heads_t = jnp.zeros((H, _HEADS_W), jnp.float32)
    w_heads_t = w_heads_t.at[:, :A].set(w_pol.T)
    w_heads_t = w_heads_t.at[:, A].set(w_val[0])
    b_heads = jnp.zeros((1, _HEADS_W), jnp.float32)     # both head biases are 0

    return {
        "w_ih_t": w_ih.T,                      # (input, 4H)
        "w_hh_t": w_hh.T,                      # (H, 4H)
        "b_gates": b.reshape(1, 4 * H),        # (1, 4H)
        "w_heads_t": w_heads_t,                # (H, 128)
        "b_heads": b_heads,                    # (1, 128)
        "num_actions": A,
        "input_size": input_size,
        "hidden_size": H,
    }


def init_state(batch_size, hidden_size):
    h = jnp.zeros((batch_size, hidden_size), jnp.float32)
    c = jnp.zeros((batch_size, hidden_size), jnp.float32)
    return {"controller": (h, c)}


# ----------------------------------------------------------------------------
# Pure-JAX reference for correctness checks
# ----------------------------------------------------------------------------
def _reference_step(x, h, c, p):
    I, H, A = p["input_size"], p["hidden_size"], p["num_actions"]
    w_ih_t, w_hh_t = p["w_ih_t"], p["w_hh_t"]
    gates = x @ w_ih_t + h @ w_hh_t + p["b_gates"]
    i = jax.nn.sigmoid(gates[:, :H])
    f = jax.nn.sigmoid(gates[:, H:2 * H])
    g = jnp.tanh(gates[:, 2 * H:3 * H])
    o = jax.nn.sigmoid(gates[:, 3 * H:])
    c_new = f * c + i * g
    h_new = o * jnp.tanh(c_new)
    w_pol_t = p["w_heads_t"][:, :A]
    w_val_t = p["w_heads_t"][:, A:A + 1]
    logits = h_new @ w_pol_t + p["b_heads"][:, :A]
    value = (h_new @ w_val_t + p["b_heads"][:, A:A + 1])[:, 0]
    return logits, value, (h_new, c_new)


def _reference_rollout(xs, h, c, p):
    def step(carry, x):
        h, c = carry
        logits, value, (h, c) = _reference_step(x, h, c, p)
        logp = logits - jax.nn.logsumexp(logits, axis=-1, keepdims=True)
        return (h, c), (logits, value, logp)
    (hT, cT), (logits, values, logps) = jax.lax.scan(step, (h, c), xs)
    return logits, values, logps, (hT, cT)


if __name__ == "__main__":
    B, INPUT, HIDDEN, ACTIONS, T = 2, 16, 32, 8, 12

    key = jax.random.PRNGKey(0)
    k_params, k_x = jax.random.split(key)

    params = init_params(k_params, INPUT, HIDDEN, ACTIONS)
    state = init_state(B, HIDDEN)
    h0, c0 = state["controller"]
    xs = jax.random.normal(k_x, (T, B, INPUT), jnp.float32)

    # Multi-step rollout: ONE pallas_call for all T steps (the perf-relevant path).
    logits, values, log_probs, (hT, cT) = lstm_baseline_rollout(xs, h0, c0, params)
    jax.block_until_ready((logits, values, log_probs, hT, cT))

    # Single step (matches the PyTorch module's forward signature).
    l0, v0, lp0, (h1, c1) = lstm_baseline_step(xs[0], h0, c0, params)
    jax.block_until_ready((l0, v0, lp0, h1, c1))

    # Pure-JAX references.
    r_logits, r_values, r_logps, (r_hT, r_cT) = _reference_rollout(xs, h0, c0, params)
    s_logits, s_value, (s_h1, s_c1) = _reference_step(xs[0], h0, c0, params)
    s_logp = s_logits - jax.nn.logsumexp(s_logits, axis=-1, keepdims=True)

    ok = lambda a, b: bool(jnp.allclose(a, b, atol=1e-4, rtol=1e-4))
    assert logits.shape == (T, B, ACTIONS) and values.shape == (T, B)
    assert log_probs.shape == (T, B, ACTIONS)
    assert hT.shape == (B, HIDDEN) and cT.shape == (B, HIDDEN)
    assert ok(logits, r_logits), "rollout logits mismatch"
    assert ok(values, r_values), "rollout values mismatch"
    assert ok(log_probs, r_logps), "rollout log_probs mismatch"
    assert ok(hT, r_hT) and ok(cT, r_cT), "rollout final state mismatch"
    assert ok(l0, s_logits) and ok(v0, s_value), "single-step head mismatch"
    assert ok(lp0, s_logp), "single-step log_probs mismatch"
    assert ok(h1, s_h1) and ok(c1, s_c1), "single-step state mismatch"

    print("KERNEL_OK")
</pallas_src>

<mosaic_0001>
module attributes {stable_mosaic.version = 11 : i64} {
  func.func @_lstm_rollout_kernel(%arg0: i32, %arg1: memref<1x8x16xf32, #tpu.memory_space<vmem>>, %arg2: memref<8x32xf32, #tpu.memory_space<vmem>>, %arg3: memref<8x32xf32, #tpu.memory_space<vmem>>, %arg4: memref<16x128xf32, #tpu.memory_space<vmem>>, %arg5: memref<32x128xf32, #tpu.memory_space<vmem>>, %arg6: memref<1x128xf32, #tpu.memory_space<vmem>>, %arg7: memref<32x128xf32, #tpu.memory_space<vmem>>, %arg8: memref<1x128xf32, #tpu.memory_space<vmem>>, %arg9: memref<1x8x128xf32, #tpu.memory_space<vmem>>, %arg10: memref<8x32xf32, #tpu.memory_space<vmem>>, %arg11: memref<8x32xf32, #tpu.memory_space<vmem>>, %arg12: memref<8x32xf32, #tpu.memory_space<vmem>>, %arg13: memref<8x32xf32, #tpu.memory_space<vmem>>) attributes {dimension_semantics = [#tpu.dimension_semantics<arbitrary>], iteration_bounds = array<i64: 12>, scalar_prefetch = 0 : i64, scratch_operands = 2 : i64, tpu.core_type = #tpu.core_type<tc>, window_params = [{transform_indices = @transform_0, window_bounds = array<i64: 1, 8, 16>}, {pipeline_mode = #tpu.pipeline_mode<synchronous>, transform_indices = @transform_1, window_bounds = array<i64: 8, 32>}, {pipeline_mode = #tpu.pipeline_mode<synchronous>, transform_indices = @transform_2, window_bounds = array<i64: 8, 32>}, {pipeline_mode = #tpu.pipeline_mode<synchronous>, transform_indices = @transform_3, window_bounds = array<i64: 16, 128>}, {pipeline_mode = #tpu.pipeline_mode<synchronous>, transform_indices = @transform_4, window_bounds = array<i64: 32, 128>}, {pipeline_mode = #tpu.pipeline_mode<synchronous>, transform_indices = @transform_5, window_bounds = array<i64: 1, 128>}, {pipeline_mode = #tpu.pipeline_mode<synchronous>, transform_indices = @transform_6, window_bounds = array<i64: 32, 128>}, {pipeline_mode = #tpu.pipeline_mode<synchronous>, transform_indices = @transform_7, window_bounds = array<i64: 1, 128>}, {transform_indices = @transform_8, window_bounds = array<i64: 1, 8, 128>}, {pipeline_mode = #tpu.pipeline_mode<synchronous>, transform_indices = @transform_9, window_bounds = array<i64: 8, 32>}, {pipeline_mode = #tpu.pipeline_mode<synchronous>, transform_indices = @transform_10, window_bounds = array<i64: 8, 32>}]} {
    %c0_i32 = arith.constant 0 : i32
    %0 = arith.cmpi eq, %arg0, %c0_i32 : i32
    %1 = arith.extui %0 : i1 to i32
    %c0_i32_0 = arith.constant 0 : i32
    %2 = arith.cmpi ne, %1, %c0_i32_0 : i32
    scf.if %2 {
      %c0_32 = arith.constant 0 : index
      %c0_33 = arith.constant 0 : index
      %64 = vector.load %arg2[%c0_32, %c0_33] : memref<8x32xf32, #tpu.memory_space<vmem>>, vector<8x32xf32>
      %c0_34 = arith.constant 0 : index
      %c0_35 = arith.constant 0 : index
      %65 = vector.load %arg12[%c0_34, %c0_35] : memref<8x32xf32, #tpu.memory_space<vmem>>, vector<8x32xf32>
      tpu.vector_store %arg12[%c0_34, %c0_35], %64 {strides = array<i32>} : memref<8x32xf32, #tpu.memory_space<vmem>>, vector<8x32xf32>,
      %c0_36 = arith.constant 0 : index
      %c0_37 = arith.constant 0 : index
      %66 = vector.load %arg3[%c0_36, %c0_37] : memref<8x32xf32, #tpu.memory_space<vmem>>, vector<8x32xf32>
      %c0_38 = arith.constant 0 : index
      %c0_39 = arith.constant 0 : index
      %67 = vector.load %arg13[%c0_38, %c0_39] : memref<8x32xf32, #tpu.memory_space<vmem>>, vector<8x32xf32>
      tpu.vector_store %arg13[%c0_38, %c0_39], %66 {strides = array<i32>} : memref<8x32xf32, #tpu.memory_space<vmem>>, vector<8x32xf32>,
    } else {
    }
    %c0 = arith.constant 0 : index
    %c0_1 = arith.constant 0 : index
    %c0_2 = arith.constant 0 : index
    %3 = vector.load %arg1[%c0, %c0_1, %c0_2] : memref<1x8x16xf32, #tpu.memory_space<vmem>>, vector<1x8x16xf32>
    %4 = vector.shape_cast %3 : vector<1x8x16xf32> to vector<8x16xf32>
    %c0_3 = arith.constant 0 : index
    %c0_4 = arith.constant 0 : index
    %5 = vector.load %arg12[%c0_3, %c0_4] : memref<8x32xf32, #tpu.memory_space<vmem>>, vector<8x32xf32>
    %c0_5 = arith.constant 0 : index
    %c0_6 = arith.constant 0 : index
    %6 = vector.load %arg13[%c0_5, %c0_6] : memref<8x32xf32, #tpu.memory_space<vmem>>, vector<8x32xf32>
    %c0_7 = arith.constant 0 : index
    %c0_8 = arith.constant 0 : index
    %7 = vector.load %arg4[%c0_7, %c0_8] : memref<16x128xf32, #tpu.memory_space<vmem>>, vector<16x128xf32>
    %cst = arith.constant dense<0.000000e+00> : vector<8x128xf32>
    %8 = tpu.matmul %4, %7, %cst {dimension_numbers = #tpu.dot_dimension_numbers<[1], [0], [0], [1], [0, 0, 1, 1], [], []>} : vector<8x16xf32>, vector<16x128xf32>, vector<8x128xf32> -> vector<8x128xf32>
    %c0_9 = arith.constant 0 : index
    %c0_10 = arith.constant 0 : index
    %9 = vector.load %arg5[%c0_9, %c0_10] : memref<32x128xf32, #tpu.memory_space<vmem>>, vector<32x128xf32>
    %cst_11 = arith.constant dense<0.000000e+00> : vector<8x128xf32>
    %10 = tpu.matmul %5, %9, %cst_11 {dimension_numbers = #tpu.dot_dimension_numbers<[1], [0], [0], [1], [0, 0, 1, 1], [], []>} : vector<8x32xf32>, vector<32x128xf32>, vector<8x128xf32> -> vector<8x128xf32>
    %11 = arith.addf %8, %10 : vector<8x128xf32>
    %c0_12 = arith.constant 0 : index
    %c0_13 = arith.constant 0 : index
    %12 = vector.load %arg6[%c0_12, %c0_13] : memref<1x128xf32, #tpu.memory_space<vmem>>, vector<1x128xf32>
    %13 = vector.broadcast %12 : vector<1x128xf32> to vector<8x128xf32>
    %14 = arith.addf %11, %13 : vector<8x128xf32>
    %15 = arith.negf %14 : vector<8x128xf32>
    %16 = math.exp %15 : vector<8x128xf32>
    %cst_14 = arith.constant 1.000000e+00 : f32
    %17 = vector.broadcast %cst_14 : f32 to vector<8x128xf32>
    %18 = arith.addf %17, %16 : vector<8x128xf32>
    %19 = arith.divf %17, %18 : vector<8x128xf32>
    %20 = math.tanh %14 : vector<8x128xf32>
    %21 = vector.extract_strided_slice %19 {offsets = [0, 0], sizes = [8, 32], strides = [1, 1]} : vector<8x128xf32> to vector<8x32xf32>
    %22 = vector.extract_strided_slice %19 {offsets = [0, 32], sizes = [8, 32], strides = [1, 1]} : vector<8x128xf32> to vector<8x32xf32>
    %23 = vector.extract_strided_slice %20 {offsets = [0, 64], sizes = [8, 32], strides = [1, 1]} : vector<8x128xf32> to vector<8x32xf32>
    %24 = vector.extract_strided_slice %19 {offsets = [0, 96], sizes = [8, 32], strides = [1, 1]} : vector<8x128xf32> to vector<8x32xf32>
    %25 = arith.mulf %22, %6 : vector<8x32xf32>
    %26 = arith.mulf %21, %23 : vector<8x32xf32>
    %27 = arith.addf %25, %26 : vector<8x32xf32>
    %28 = math.tanh %27 : vector<8x32xf32>
    %29 = arith.mulf %24, %28 : vector<8x32xf32>
    %c0_15 = arith.constant 0 : index
    %c0_16 = arith.constant 0 : index
    %30 = vector.load %arg12[%c0_15, %c0_16] : memref<8x32xf32, #tpu.memory_space<vmem>>, vector<8x32xf32>
    tpu.vector_store %arg12[%c0_15, %c0_16], %29 {strides = array<i32>} : memref<8x32xf32, #tpu.memory_space<vmem>>, vector<8x32xf32>,
    %c0_17 = arith.constant 0 : index
    %c0_18 = arith.constant 0 : index
    %31 = vector.load %arg13[%c0_17, %c0_18] : memref<8x32xf32, #tpu.memory_space<vmem>>, vector<8x32xf32>
    tpu.vector_store %arg13[%c0_17, %c0_18], %27 {strides = array<i32>} : memref<8x32xf32, #tpu.memory_space<vmem>>, vector<8x32xf32>,
    %c0_19 = arith.constant 0 : index
    %c0_20 = arith.constant 0 : index
    %32 = vector.load %arg7[%c0_19, %c0_20] : memref<32x128xf32, #tpu.memory_space<vmem>>, vector<32x128xf32>
    %cst_21 = arith.constant dense<0.000000e+00> : vector<8x128xf32>
    %33 = tpu.matmul %29, %32, %cst_21 {dimension_numbers = #tpu.dot_dimension_numbers<[1], [0], [0], [1], [0, 0, 1, 1], [], []>} : vector<8x32xf32>, vector<32x128xf32>, vector<8x128xf32> -> vector<8x128xf32>
    %c0_22 = arith.constant 0 : index
    %c0_23 = arith.constant 0 : index
    %34 = vector.load %arg8[%c0_22, %c0_23] : memref<1x128xf32, #tpu.memory_space<vmem>>, vector<1x128xf32>
    %35 = vector.broadcast %34 : vector<1x128xf32> to vector<8x128xf32>
    %36 = arith.addf %33, %35 : vector<8x128xf32>
    %37 = tpu.iota {dimensions = array<i32: 1>} : vector<8x128xi32>
    %c8_i32 = arith.constant 8 : i32
    %38 = vector.broadcast %c8_i32 : i32 to vector<8x128xi32>
    %39 = arith.cmpi slt, %37, %38 : vector<8x128xi32>
    %cst_24 = arith.constant 0xFF800000 : f32
    %40 = vector.broadcast %cst_24 : f32 to vector<8x128xf32>
    %41 = arith.select %39, %36, %40 : vector<8x128xi1>, vector<8x128xf32>
    %cst_25 = arith.constant dense<0xFF800000> : vector<8xf32>
    %42 = vector.multi_reduction <maximumf>, %41, %cst_25 [1] : vector<8x128xf32> to vector<8xf32>
    %43 = vector.shape_cast %42 : vector<8xf32> to vector<8x1xf32>
    %44 = vector.broadcast %43 : vector<8x1xf32> to vector<8x128xf32>
    %45 = arith.subf %36, %44 : vector<8x128xf32>
    %cst_26 = arith.constant 0xFF800000 : f32
    %46 = vector.broadcast %cst_26 : f32 to vector<8x128xf32>
    %47 = arith.select %39, %45, %46 : vector<8x128xi1>, vector<8x128xf32>
    %48 = math.exp %47 : vector<8x128xf32>
    %cst_27 = arith.constant dense<0.000000e+00> : vector<8xf32>
    %49 = vector.multi_reduction <add>, %48, %cst_27 [1] : vector<8x128xf32> to vector<8xf32>
    %50 = vector.shape_cast %49 : vector<8xf32> to vector<8x1xf32>
    %51 = math.log %50 : vector<8x1xf32>
    %52 = arith.addf %43, %51 : vector<8x1xf32>
    %c9_i32 = arith.constant 9 : i32
    %53 = vector.broadcast %c9_i32 : i32 to vector<8x128xi32>
    %54 = arith.cmpi eq, %37, %53 : vector<8x128xi32>
    %55 = vector.shape_cast %52 : vector<8x1xf32> to vector<8x1xf32>
    %56 = vector.broadcast %55 : vector<8x1xf32> to vector<8x128xf32>
    %57 = arith.select %54, %56, %36 : vector<8x128xi1>, vector<8x128xf32>
    %c0_28 = arith.constant 0 : index
    %c0_29 = arith.constant 0 : index
    %c0_30 = arith.constant 0 : index
    %58 = vector.load %arg9[%c0_28, %c0_29, %c0_30] : memref<1x8x128xf32, #tpu.memory_space<vmem>>, vector<1x8x128xf32>
    %59 = vector.shape_cast %58 : vector<1x8x128xf32> to vector<8x128xf32>
    %60 = vector.shape_cast %57 : vector<8x128xf32> to vector<1x8x128xf32>
    tpu.vector_store %arg9[%c0_28, %c0_29, %c0_30], %60 {strides = array<i32>} : memref<1x8x128xf32, #tpu.memory_space<vmem>>, vector<1x8x128xf32>,
    %c11_i32 = arith.constant 11 : i32
    %61 = arith.cmpi eq, %arg0, %c11_i32 : i32
    %62 = arith.extui %61 : i1 to i32
    %c0_i32_31 = arith.constant 0 : i32
    %63 = arith.cmpi ne, %62, %c0_i32_31 : i32
    scf.if %63 {
      %c0_32 = arith.constant 0 : index
      %c0_33 = arith.constant 0 : index
      %64 = vector.load %arg10[%c0_32, %c0_33] : memref<8x32xf32, #tpu.memory_space<vmem>>, vector<8x32xf32>
      tpu.vector_store %arg10[%c0_32, %c0_33], %29 {strides = array<i32>} : memref<8x32xf32, #tpu.memory_space<vmem>>, vector<8x32xf32>,
      %c0_34 = arith.constant 0 : index
      %c0_35 = arith.constant 0 : index
      %65 = vector.load %arg11[%c0_34, %c0_35] : memref<8x32xf32, #tpu.memory_space<vmem>>, vector<8x32xf32>
      tpu.vector_store %arg11[%c0_34, %c0_35], %27 {strides = array<i32>} : memref<8x32xf32, #tpu.memory_space<vmem>>, vector<8x32xf32>,
    } else {
    }
    return
  }
  func.func @transform_0(%arg0: i32) -> (i32, i32, i32) {
    %c0_i32 = arith.constant 0 : i32
    %c0_i32_0 = arith.constant 0 : i32
    %c0_i32_1 = arith.constant 0 : i32
    return %arg0, %c0_i32, %c0_i32_0 : i32, i32, i32
  }
  func.func @transform_1(%arg0: i32) -> (i32, i32) {
    %c0_i32 = arith.constant 0 : i32
    %c0_i32_0 = arith.constant 0 : i32
    %c0_i32_1 = arith.constant 0 : i32
    return %c0_i32, %c0_i32_0 : i32, i32
  }
  func.func @transform_2(%arg0: i32) -> (i32, i32) {
    %c0_i32 = arith.constant 0 : i32
    %c0_i32_0 = arith.constant 0 : i32
    %c0_i32_1 = arith.constant 0 : i32
    return %c0_i32, %c0_i32_0 : i32, i32
  }
  func.func @transform_3(%arg0: i32) -> (i32, i32) {
    %c0_i32 = arith.constant 0 : i32
    %c0_i32_0 = arith.constant 0 : i32
    %c0_i32_1 = arith.constant 0 : i32
    return %c0_i32, %c0_i32_0 : i32, i32
  }
  func.func @transform_4(%arg0: i32) -> (i32, i32) {
    %c0_i32 = arith.constant 0 : i32
    %c0_i32_0 = arith.constant 0 : i32
    %c0_i32_1 = arith.constant 0 : i32
    return %c0_i32, %c0_i32_0 : i32, i32
  }
  func.func @transform_5(%arg0: i32) -> (i32, i32) {
    %c0_i32 = arith.constant 0 : i32
    %c0_i32_0 = arith.constant 0 : i32
    %c0_i32_1 = arith.constant 0 : i32
    return %c0_i32, %c0_i32_0 : i32, i32
  }
  func.func @transform_6(%arg0: i32) -> (i32, i32) {
    %c0_i32 = arith.constant 0 : i32
    %c0_i32_0 = arith.constant 0 : i32
    %c0_i32_1 = arith.constant 0 : i32
    return %c0_i32, %c0_i32_0 : i32, i32
  }
  func.func @transform_7(%arg0: i32) -> (i32, i32) {
    %c0_i32 = arith.constant 0 : i32
    %c0_i32_0 = arith.constant 0 : i32
    %c0_i32_1 = arith.constant 0 : i32
    return %c0_i32, %c0_i32_0 : i32, i32
  }
  func.func @transform_8(%arg0: i32) -> (i32, i32, i32) {
    %c0_i32 = arith.constant 0 : i32
    %c0_i32_0 = arith.constant 0 : i32
    %c0_i32_1 = arith.constant 0 : i32
    return %arg0, %c0_i32, %c0_i32_0 : i32, i32, i32
  }
  func.func @transform_9(%arg0: i32) -> (i32, i32) {
    %c0_i32 = arith.constant 0 : i32
    %c0_i32_0 = arith.constant 0 : i32
    %c0_i32_1 = arith.constant 0 : i32
    return %c0_i32, %c0_i32_0 : i32, i32
  }
  func.func @transform_10(%arg0: i32) -> (i32, i32) {
    %c0_i32 = arith.constant 0 : i32
    %c0_i32_0 = arith.constant 0 : i32
    %c0_i32_1 = arith.constant 0 : i32
    return %c0_i32, %c0_i32_0 : i32, i32
  }
}

</mosaic_0001>

<bundles_post_ra>
// kernel: tpu_custom_call.1
= control target key start
LH: loop header
LB: loop body
LE: loop exit
PB: predicated region body
PF: predicated region fallthrough
CT: control target
= control target key end

     0   :  { %s1898_s0 = inlined_call_operand.hbm [shape: f32[12,8,16], index: 0, kind: input, shape index: {}]   ;;  %s1899_s1 = inlined_call_operand.hbm [shape: f32[8,32], index: 1, kind: input, shape index: {}]   ;;  %s1900_s2 = inlined_call_operand.hbm [shape: f32[8,32], index: 2, kind: input, shape index: {}]   ;;  %s1901_s3 = inlined_call_operand.hbm [shape: f32[16,128], index: 3, kind: input, shape index: {}]   ;;  %s1902_s4 = inlined_call_operand.hbm [shape: f32[32,128], index: 4, kind: input, shape index: {}]   ;;  %s1903_s5 = inlined_call_operand.vmem [shape: f32[1,128], index: 5, kind: input, shape index: {}]   ;;  %s1904_s6 = inlined_call_operand.hbm [shape: f32[32,128], index: 6, kind: input, shape index: {}]   ;;  %s1905_s7 = inlined_call_operand.vmem [shape: f32[1,128], index: 7, kind: input, shape index: {}]   ;;  %s1906_s8 = inlined_call_operand.hbm [shape: f32[12,8,128], index: 8, kind: output, shape index: {0}]   ;;  %s1907_s9 = inlined_call_operand.hbm [shape: f32[8,32], index: 9, kind: output, shape index: {1}]   ;;  %s1908_s10 = inlined_call_operand.hbm [shape: f32[8,32], index: 10, kind: output, shape index: {2}]  }
   0x1   :  { %1917 = sst [smem:[#allocation25_spill]] %s1899_s1 }
   0x2   :  { %1918 = sst [smem:[#allocation26_spill]] %s1900_s2 }
   0x3   :  { %16 = vsyncpa [#allocation5], 0 }
   0x4   :  { %18 = vsyncpa [#allocation5 + $0x1], 0 }
   0x5   :  { %19 = vsyncpa [#allocation8], 0 }
   0x6   :  { %20 = vsyncpa [#allocation11], 0 }
   0x7   :  { %21 = vsyncpa [#allocation14], 0 }
   0x8   :  { %22 = vsyncpa [#allocation6], 0 }
   0x9   :  { %24 = vsyncpa [#allocation6 + $0x1], 0 }
   0xa   :  { %25 = vsyncpa [#allocation17], 0  ;;  %s1534_s13 = smov 0   ;;  %s1536_s14 = smov 0  }
   0xb   :  { %s1538_s15 = smov 0   ;;  %s1540_s16 = smov 0  }
   0xc LB: > { %s1462_s17 = smov [#allocation7]   ;;  %s1555_s19 = sadd.s32 4294967295, %s1460_s16   ;;  %s1460_s16 = sphi %s1540_s16, %s1952_s16   ;;  %s1456_s15 = sphi %s1538_s15, %s1951_s15   ;;  %s1452_s14 = sphi %s1536_s14, %s1950_s14   ;;  %s1448_s13 = sphi %s1534_s13, %s1949_s13  }
   0xd   : > { %s290_s18 = sshll.u32 %s1462_s17, 4  ;;  %p935_p0 = scmp.ge.s32.totalorder %s1460_s16, 1  ;;  %s291_s18 = int_to_ptr.vmem [resolvable:$true] %s290_s18 }
   0xe   : > { %p1909_p1 = scmp.eq.s32.totalorder %s1555_s19, 0  ;;  %p277_p2 = scmp.lt.s32.totalorder %s1460_s16, 13 }
   0xf   : > { %s1463_s21 = smov [#allocation10]   ;;  %s1464_s24 = smov [#allocation9]  }
  0x10   : > { %p1561_p4 = pnand %p935_p0, %p277_p2  ;;  %s311_s22 = sshll.u32 %s1463_s21, 4  ;;  %s1567_s22 = int_to_ptr.vmem [resolvable:$true] %s311_s22 }
  0x11   : > { %s301_s25 = sshll.u32 %s1464_s24, 4  ;;  %s1921_s1 = sld [smem:[#allocation25_spill]]  ;;  %s1575_s25 = int_to_ptr.vmem [resolvable:$true] %s301_s25 }
  0x12   : > { %s1919_s20 = scalar_select %p1561_p4, 1, 0 }
  0x13   : > { %p1057_p5 = pneg %p1561_p4 }
  0x15   : > { %p1571_p6 = pnand %p1057_p5, %p1909_p1 }
  0x17   : > { %s1156_s28 = scalar_lea.hbm %s1921_s1, 128  ;;  %p1585_p8 = pneg %p1571_p6 }
  0x18   : > { %p1157_p7 = scmp.ne.s32.totalorder %s1921_s1, %s1156_s28  ;;  %p1163_p11 = scmp.lt.u32.totalorder %s1156_s28, %s1921_s1 }
  0x1a   : > { %p1159_p9 = pnand %p1585_p8, %p1157_p7 }
  0x1c   : > { %p1160_p10 = pneg %p1159_p9 }
  0x1e   : > { %p1165_p12 = pnand %p1163_p11, %p1160_p10 }
  0x20   : > { %1168 = shalt.err (!%p1165_p12)
}
  0x21   : > { %s1169_s21 = scalar_lea.vmem %s291_s18, 128  ;;  %p1177_p5 = scmp.lt.s32.totalorder %s291_s18, %s291_s18 }
  0x22   : > { %p1170_p13 = scmp.ne.s32.totalorder %s291_s18, %s1169_s21  ;;  %p1178_p3 = scmp.lt.s32.totalorder %s1169_s21, %s1169_s21 }
  0x24   : > { %p1172_p0 = pnand %p1170_p13, %p1585_p8  ;;  %p1179_p1 = por %p1178_p3, %p1177_p5 }
  0x26   : > { %p1173_p2 = pneg %p1172_p0 }
  0x28   : > { %p1180_p4 = pnand %p1179_p1, %p1173_p2 }
  0x2a   : > { %1183 = shalt.err (!%p1180_p4)
}
  0x2b   : > { %1060 = dma.hbm_to_vmem [thread:$0]  (!%p1571_p6), %s1921_s1, 128, %s291_s18, [#allocation8]  }
  0x2c   : > { %s1184_s29 = scalar_lea.hbm %s1901_s3, 256 }
  0x2d   : > { %p1185_p7 = scmp.ne.s32.totalorder %s1901_s3, %s1184_s29  ;;  %p1191_p1 = scmp.lt.u32.totalorder %s1184_s29, %s1901_s3 }
  0x2f   : > { %p1187_p9 = pnand %p1185_p7, %p1585_p8 }
  0x31   : > { %p1188_p3 = pneg %p1187_p9 }
  0x33   : > { %p1193_p4 = pnand %p1191_p1, %p1188_p3 }
  0x35   : > { %1196 = shalt.err (!%p1193_p4)
}
  0x36   : > { %s1197_s18 = scalar_lea.vmem %s1567_s22, 256  ;;  %p1205_p13 = scmp.lt.s32.totalorder %s1567_s22, %s1567_s22 }
  0x37   : > { %p1198_p10 = scmp.ne.s32.totalorder %s1567_s22, %s1197_s18  ;;  %p1206_p0 = scmp.lt.s32.totalorder %s1197_s18, %s1197_s18 }
  0x39   : > { %p1200_p11 = pnand %p1198_p10, %p1585_p8  ;;  %p1207_p2 = por %p1206_p0, %p1205_p13 }
  0x3b   : > { %p1201_p12 = pneg %p1200_p11 }
  0x3d   : > { %p1208_p5 = pnand %p1207_p2, %p1201_p12 }
  0x3f   : > { %1211 = shalt.err (!%p1208_p5)
}
  0x40   : > { %s1911_s24 = smov 128   ;;  %s1913_s26 = smov 8  }
  0x41   : > { %1066 = dma.hbm_to_vmem [thread:$0]  (!%p1571_p6), %s1901_s3, 256, %s1567_s22, [#allocation11], %s1911_s24, %s1911_s24, %s1913_s26  }
  0x42   : > { %s1923_s2 = sld [smem:[#allocation26_spill]] }
  0x48   : > { %s1212_s12 = scalar_lea.hbm %s1923_s2, 128 }
  0x49   : > { %p1213_p7 = scmp.ne.s32.totalorder %s1923_s2, %s1212_s12  ;;  %p1219_p1 = scmp.lt.u32.totalorder %s1212_s12, %s1923_s2 }
  0x4b   : > { %p1215_p9 = pnand %p1213_p7, %p1585_p8 }
  0x4d   : > { %p1216_p3 = pneg %p1215_p9 }
  0x4f   : > { %p1221_p4 = pnand %p1219_p1, %p1216_p3 }
  0x51   : > { %1224 = shalt.err (!%p1221_p4)
}
  0x52   : > { %s1225_s22 = scalar_lea.vmem %s1575_s25, 128  ;;  %p1233_p13 = scmp.lt.s32.totalorder %s1575_s25, %s1575_s25 }
  0x53   : > { %p1226_p10 = scmp.ne.s32.totalorder %s1575_s25, %s1225_s22  ;;  %p1234_p0 = scmp.lt.s32.totalorder %s1225_s22, %s1225_s22 }
  0x55   : > { %p1228_p11 = pnand %p1226_p10, %p1585_p8  ;;  %p1235_p2 = por %p1234_p0, %p1233_p13 }
  0x57   : > { %p1229_p12 = pneg %p1228_p11 }
  0x59   : > { %p1236_p5 = pnand %p1235_p2, %p1229_p12 }
  0x5b   : > { %1239 = shalt.err (!%p1236_p5)
}
  0x5c   : > { %1063 = dma.hbm_to_vmem [thread:$0]  (!%p1571_p6), %s1923_s2, 128, %s1575_s25, [#allocation8]  }
  0x5d   : > { %s1467_s28 = smov [#allocation12]   ;;  %s1468_s30 = smov [#allocation13]  }
  0x5e   : > { %s324_s29 = sshll.u32 %s1467_s28, 4  ;;  %s340_s12 = sshll.u32 %s1468_s30, 4  ;;  %s325_s29 = int_to_ptr.vmem [resolvable:$true] %s324_s29  ;;  %s341_s12 = int_to_ptr.vmem [resolvable:$true] %s340_s12 }
  0x5f   : > { %s1240_s18 = scalar_lea.hbm %s1902_s4, 512 }
  0x60   : > { %p1241_p7 = scmp.ne.s32.totalorder %s1902_s4, %s1240_s18  ;;  %p1247_p1 = scmp.lt.u32.totalorder %s1240_s18, %s1902_s4 }
  0x62   : > { %p1243_p9 = pnand %p1241_p7, %p1585_p8 }
  0x64   : > { %p1244_p3 = pneg %p1243_p9 }
  0x66   : > { %p1249_p4 = pnand %p1247_p1, %p1244_p3 }
  0x68   : > { %1252 = shalt.err (!%p1249_p4)
}
  0x69   : > { %s1253_s25 = scalar_lea.vmem %s325_s29, 512  ;;  %p1261_p13 = scmp.lt.s32.totalorder %s325_s29, %s325_s29 }
  0x6a   : > { %p1254_p10 = scmp.ne.s32.totalorder %s325_s29, %s1253_s25  ;;  %p1262_p0 = scmp.lt.s32.totalorder %s1253_s25, %s1253_s25 }
  0x6c   : > { %p1256_p11 = pnand %p1254_p10, %p1585_p8  ;;  %p1263_p2 = por %p1262_p0, %p1261_p13 }
  0x6e   : > { %p1257_p12 = pneg %p1256_p11 }
  0x70   : > { %p1264_p5 = pnand %p1263_p2, %p1257_p12 }
  0x72   : > { %1267 = shalt.err (!%p1264_p5)
}
  0x73   : > { %s1924_s24 = smov 8   ;;  %s1925_s27 = smov 128  }
  0x74   : > { %1069 = dma.hbm_to_vmem [thread:$0]  (!%p1571_p6), %s1902_s4, 512, %s325_s29, [#allocation11], %s1925_s27, %s1925_s27, %s1924_s24  }
  0x75   : > { %s1268_s21 = scalar_lea.hbm %s1904_s6, 512 }
  0x76   : > { %p1269_p7 = scmp.ne.s32.totalorder %s1904_s6, %s1268_s21  ;;  %p1275_p1 = scmp.lt.u32.totalorder %s1268_s21, %s1904_s6 }
  0x78   : > { %p1271_p9 = pnand %p1269_p7, %p1585_p8 }
  0x7a   : > { %p1272_p3 = pneg %p1271_p9 }
  0x7c   : > { %p1277_p4 = pnand %p1275_p1, %p1272_p3 }
  0x7e   : > { %1280 = shalt.err (!%p1277_p4)
}
  0x7f   : > { %s1281_s26 = scalar_lea.vmem %s341_s12, 512  ;;  %p1289_p13 = scmp.lt.s32.totalorder %s341_s12, %s341_s12 }
  0x80   : > { %p1282_p10 = scmp.ne.s32.totalorder %s341_s12, %s1281_s26  ;;  %p1290_p0 = scmp.lt.s32.totalorder %s1281_s26, %s1281_s26 }
  0x82   : > { %p1284_p11 = pnand %p1282_p10, %p1585_p8  ;;  %p1291_p2 = por %p1290_p0, %p1289_p13 }
  0x84   : > { %p1285_p12 = pneg %p1284_p11 }
  0x86   : > { %p1292_p5 = pnand %p1291_p2, %p1285_p12 }
  0x88   : > { %1295 = shalt.err (!%p1292_p5)
}
  0x89   : > { %1072 = dma.hbm_to_vmem [thread:$0]  (!%p1571_p6), %s1904_s6, 512, %s341_s12, [#allocation14], %s1925_s27, %s1925_s27, %s1924_s24  }
  0x8a   : > { %s934_s23 = sadd.s32 4294967294, %s1460_s16   ;;  %s1694_s11 = sadd.s32 1, %s1460_s16  }
  0x8b   : > { %s38_s30 = sadd.s32 1, %s1456_s15  ;;  %s35_s17 = ssub.s32 %s1460_s16, %s1694_s11 }
  0x8c   : > { %p45_p8 = scmp.ne.s32.totalorder %s1456_s15, %s1452_s14  ;;  %p36_p7 = scmp.eq.s32.totalorder %s35_s17, 0 }
  0x8d   : > { %p46_p9 = scmp.eq.s32.totalorder %s1460_s16, 0  ;;  %p51_p3 = scmp.ne.s32.totalorder %s1452_s14, %s1448_s13 }
  0x8e   : > { %p1915_p1 = scmp.eq.s32.totalorder %s1555_s19, 11  ;;  %p1926_p10 = scmp.eq.s32.totalorder %s1555_s19, 0 }
  0x8f   : > { %s1706_s21 = scalar_select %p36_p7, %s1456_s15, %s38_s30  }
  0x90   : > { %p47_p4 = por %p46_p9, %p45_p8  ;;  %p1710_p11 = por %p1926_p10, %p51_p3 }
  0x91   : > { %p1716_p6 = por %p1915_p1, %p45_p8  ;;  %p228_p12 = scmp.eq.s32.totalorder %s934_s23, 11 }
  0x92   : > { %p1086_p13 = scmp.lt.s32.totalorder %s1460_s16, 12  ;;  %s357_s24 = sand.u32 1, %s1456_s15  }
  0x93   : > { %s1928_s12 = scalar_select %p1716_p6, 1, 0 }
  0x94   : > { %p1722_p0 = por %p228_p12, %p51_p3  ;;  %s942_s22 = sshll.u32 %s357_s24, 3 }
  0x95   : > { %s943_s1 = sshll.u32 %s1460_s16, 7  ;;  %s361_s28 = scalar_lea.vmem [#allocation4], %s942_s22 }
  0x96   : > { %s1929_s27 = scalar_select %p1722_p0, 1, 0 }
  0x97   : > { %s1730_s29 = scalar_lea.hbm %s1898_s0, %s943_s1  ;;  %s368_s30 = sshll.u32 %s361_s28, 4  ;;  %s1736_s30 = int_to_ptr.vmem [resolvable:$true] %s368_s30 }
  0x98   : > { %p1732_p2 = pnand %p1086_p13, %p47_p4  ;;  %s358_s17 = scalar_lea.sflag [#allocation5], %s357_s24 }
  0x99   : > { %s1296_s2 = scalar_lea.hbm %s1730_s29, 128  ;;  %s1301_s25 = scalar_lea.hbm %s1898_s0, 1536 }
  0x9a   : > { %p1297_p5 = scmp.ne.s32.totalorder %s1730_s29, %s1296_s2  ;;  %p1298_p8 = pneg %p1732_p2 }
  0x9b   : > { %p1302_p3 = scmp.lt.u32.totalorder %s1730_s29, %s1898_s0  ;;  %p1303_p4 = scmp.lt.u32.totalorder %s1301_s25, %s1296_s2 }
  0x9c   : > { %p1299_p7 = pnand %p1298_p8, %p1297_p5  ;;  %p1305_p12 = scmp.lt.u32.totalorder %s1296_s2, %s1730_s29 }
  0x9d   : > { %p1304_p10 = por %p1303_p4, %p1302_p3 }
  0x9e   : > { %p1300_p9 = pneg %p1299_p7 }
  0x9f   : > { %p1306_p13 = por %p1305_p12, %p1304_p10 }
  0xa1   : > { %p1307_p1 = pnand %p1306_p13, %p1300_p9 }
  0xa3   : > { %1310 = shalt.err (!%p1307_p1)
}
  0xa4   : > { %s1311_s24 = scalar_lea.vmem %s1736_s30, 128  ;;  %s1469_s1 = smov [#allocation4]  }
  0xa5   : > { %p1312_p5 = scmp.ne.s32.totalorder %s1736_s30, %s1311_s24  ;;  %s1316_s22 = sshll.u32 %s1469_s1, 4  ;;  %s1317_s22 = int_to_ptr.vmem [resolvable:$false] %s1316_s22 }
  0xa6   : > { %s1318_s26 = scalar_lea.vmem %s1317_s22, 256  ;;  %p1319_p6 = scmp.lt.s32.totalorder %s1736_s30, %s1317_s22 }
  0xa7   : > { %p1314_p7 = pnand %p1312_p5, %p1298_p8  ;;  %p1320_p3 = scmp.lt.s32.totalorder %s1318_s26, %s1311_s24 }
  0xa9   : > { %p1315_p0 = pneg %p1314_p7  ;;  %p1321_p4 = por %p1320_p3, %p1319_p6 }
  0xab   : > { %p1322_p10 = pnand %p1321_p4, %p1315_p0 }
  0xad   : > { %1325 = shalt.err (!%p1322_p10)
}
  0xae   : > { %1076 = dma.hbm_to_vmem [thread:$0]  (!%p1732_p2), %s1730_s29, 128, %s1736_s30, %s358_s17  }
  0xaf   : > { %p1931_p1 = scmp.ne.s32.totalorder %s1919_s20, 0 }
  0xb0   : > { %s1766_s2 = sand.u32 (!%p1931_p1), 1, %s1452_s14  }
  0xb1   : > { %377 = sbr.rel (%p1931_p1) target bundleno = 1526 (0x5f6), region = 52  ;;  %s945_s25 = sshll.u32 (!%p1931_p1), %s1766_s2, 3 }
  0xb2   : > { %s380_s28 = scalar_lea.sflag (!%p1931_p1), [#allocation5], %s1766_s2  ;;  %s1770_s24 = scalar_lea.vmem (!%p1931_p1), [#allocation4], %s945_s25 }
  0xb8   : > { %1423 = dma.done.wait (%p1710_p11), %s380_s28, 128  }
  0xb9   : > { %1425 = vsyncadd (%p1710_p11), %s380_s28, 4294967168  ;;  %p1932_p6 = scmp.eq.s32.totalorder %s1555_s19, 0 }
  0xbb   : > { %1427 = dma.done.wait (%p1932_p6), [#allocation8], 256   ;;  %p1933_p0 = pmov %p1932_p6 }
  0xbd   : > { %1429 = vsyncadd (%p1933_p0), [#allocation8], 4294967040  ;;  %p1934_p2 = pmov %p1933_p0 }
  0xbe   : > { %p1935_p8 = pmov %p1933_p0 }
  0xbf   : > { %1431 = dma.done.wait (%p1934_p2), [#allocation11], 768  }
  0xc0   : > { %1433 = vsyncadd (%p1935_p8), [#allocation11], 4294966528  ;;  %p1936_p9 = pmov %p1933_p0 }
  0xc1   : > { %p1937_p12 = pmov %p1933_p0 }
  0xc2   : > { %1435 = dma.done.wait (%p1936_p9), [#allocation14], 512  }
  0xc3   : > { %1437 = vsyncadd (%p1937_p12), [#allocation14], 4294966784  ;;  %s1788_s20 = scalar_lea.vmem [#allocation15], %s945_s25  ;;  %p1938_p11 = scmp.ne.s32.totalorder %s1555_s19, 0 }
  0xc4   : > { %v444_v0 = vld [vmem:[#allocation7] sm:$0xff] (!%p1938_p11)  ;;  %vm445_vm0 = vcmask (!%p1938_p11), 261120   ;;  %v447_v1 = vld [vmem:[#allocation9] sm:$0xff] (!%p1938_p11) }
  0xc5   : > { %443 = sbr.rel (%p1938_p11) target bundleno = 204 (0xcc), region = 80  ;;  %446 = vst.msk [vmem:[#allocation2] sm:$0xff] (!%p1938_p11), %vm445_vm0, %v444_v0  ;;  %448 = vst.msk [vmem:[#allocation3] sm:$0xff] (!%p1938_p11), %vm445_vm0, %v447_v1 }
  0xcc PF: > { %v454_v2 = vld [vmem:[#allocation12] sm:$0xff]  ;;  %v455_v3 = vld [vmem:[#allocation12 + $0x8] sm:$0xff]  ;;  %v452_v4 = vld [vmem:[#allocation10] sm:$0xff]  ;;  %v1470_v5 = vmov 0.0|0.0   ;;  %vm1471_vm1 = vmmov 0   ;;  %v1472_v11 = vmov 0.0   ;;  %v735_v44 = vlaneseq }
  0xcd   : > { %1010 = vmatprep.subr.bf16.mxu0 %v1470_v5  ;;  %v1011_v6 = vpack.c.bf16 %v455_v3, %v454_v2  ;;  %1016 = vmatprep.subr.bf16.mxu1 %v1470_v5  ;;  %v453_v7 = vld [vmem:[#allocation10 + $0x8] sm:$0xff]  ;;  %v456_v8 = vld [vmem:[#allocation12 + $0x10] sm:$0xff]  ;;  %vm532_vm2 = vcmask 130048   ;;  %v450_v14 = vld [vmem:[#allocation2] sm:$0xff]  ;;  %vm458_vm3 = vcmask 261120   ;;  %s1473_s30 = smov 64  }
  0xce   : > { %v457_v9 = vld [vmem:[#allocation12 + $0x18] sm:$0xff]  ;;  %v1017_v10 = vpack.c.bf16 %v453_v7, %v452_v4  ;;  %996 = vmatprep.mubr.msk.f32.mxu1 %vm1471_vm1, %v1472_v11  ;;  %989 = vmatprep.mubr.msk.f32.mxu0 %vm1471_vm1, %v1472_v11  ;;  %v955_v18 = vld [vmem:[%s1903_s5] ss:$0 sm:$0xff]  ;;  %v451_v23 = vld [vmem:[#allocation3] sm:$0xff]  ;;  %s1474_s23 = smov 32   ;;  %v736_v45 = vand.u32 127, %v735_v44 }
  0xcf   : > { %1012 = vmatpush3.bf16.msra.mxu0 %v1011_v6  ;;  %v1014_v12 = vpack.c.bf16 %v457_v9, %v456_v8  ;;  %v449_v13 = vld [vmem:[%s1770_s24] sm:$0xff]  ;;  %v652_v34 = vld [vmem:[#allocation13] sm:$0xff]  ;;  %v653_v35 = vld [vmem:[#allocation13 + $0x8] sm:$0xff]  ;;  %s1475_s22 = smov 96   ;;  %p959_p13 = scmp.ne.s32.totalorder %s1555_s19, 11 }
  0xd0   : > { %1013 = vmatprep.subr.bf16.mxu0 %v1470_v5  ;;  %1018 = vmatpush3.bf16.msra.mxu1 %v1017_v10  ;;  %v654_v36 = vld [vmem:[#allocation13 + $0x10] sm:$0xff]  ;;  %v1020_v37 = vpack.c.bf16 %v653_v35, %v652_v34  ;;  %v655_v38 = vld [vmem:[#allocation13 + $0x18] sm:$0xff]  ;;  %v957_v46 = vld [vmem:[%s1905_s7] ss:$0 sm:$0xff]  ;;  %vm737_vm4 = vcmp.lt.s32.totalorder %v736_v45, 8  ;;  %vm750_vm5 = vcmp.eq.s32.totalorder %v736_v45, 9 }
  0xd1   : > { %1019 = vmatprep.subr.bf16.mxu1 %v1470_v5  ;;  %v1023_v39 = vpack.c.bf16 %v655_v38, %v654_v36 }
  0xd3   : > { %1015 = vmatpush3.bf16.msra.mxu0 %v1014_v12  ;;  %997 = vmatmul.mubr.msk.f32.vlgmr.msra.gmra.mrb[0].mxu1 %vm532_vm2, %v449_v13 }
  0xd4   : > { %1007 = vmatprep.mubr.msk.f32.mxu1 %vm1471_vm1, %v1472_v11  ;;  %1021 = vmatpush3.bf16.msra.mxu1 %v1020_v37 }
  0xd5   : > { %1022 = vmatprep.subr.bf16.mxu1 %v1470_v5 }
  0xd6   : > { %990 = vmatmul.mubr.msk.f32.vlgmr.msra.gmra.mrb[0].mxu0 %vm458_vm3, %v450_v14 }
  0xd8   : > { %1024 = vmatpush3.bf16.msra.mxu1 %v1023_v39 }
 0x1a6   : > { %v602_v15 = vpop.f32.mrb[0].mxu1 }
 0x1a7   : > { %v998_v16 = vpop.f32.mrb[1].mxu1 }
 0x1a9   : > { %v528_v17 = vpop.f32.mrb[0].mxu0 }
 0x1aa   : > { %v603_v19 = vadd.f32 %v602_v15, %v528_v17  ;;  %v991_v20 = vpop.f32.mrb[1].mxu0 }
 0x1ac   : > { %v613_v21 = vadd.f32 %v955_v18, %v603_v19 }
 0x1ae   : > { %1144 = vtanh.f32 %v613_v21  ;;  %v956_v24 = vmul.f32 -1.442695, %v613_v21 }
 0x1b0   : > { %1146 = vpow2.f32 %v956_v24 }
 0x1b8   : > { %v1145_v22 = vpop.eup %1144 }
 0x1b9   : > { %627 = vrot.lane.b32.xlu0 %v1145_v22, %s1473_s30 }
 0x1ba   : > { %v1147_v25 = vpop.eup %1146 }
 0x1bb   : > { %v617_v26 = vadd.f32 1.0, %v1147_v25 }
 0x1bd   : > { %622 = vrot.lane.b32.xlu0 %v451_v23, %s1474_s23  ;;  %1148 = vrcp.f32 %v617_v26 }
 0x1c7   : > { %v1149_v27 = vpop.eup %1148 }
 0x22b   : > { %v628_v28 = vpop.permute.xlu0 %627 }
 0x22c   : > { %v630_v29 = vmul.f32 %v1149_v27, %v628_v28 }
 0x22e   : > { %632 = vrot.lane.b32.xlu1 %v630_v29, %s1474_s23 }
 0x22f   : > { %v623_v30 = vpop.permute.xlu0 %622 }
 0x230   : > { %v625_v31 = vmul.f32 %v1149_v27, %v623_v30 }
 0x2a0   : > { %v633_v32 = vpop.permute.xlu1 %632 }
 0x2a1   : > { %v635_v33 = vadd.f32 %v633_v32, %v625_v31 }
 0x2a3   : > { %1150 = vtanh.f32 %v635_v33 }
 0x2ad   : > { %v1151_v40 = vpop.eup %1150 }
 0x2ae   : > { %638 = vrot.lane.b32.xlu1 %v1151_v40, %s1473_s30 }
 0x320   : > { %v639_v41 = vpop.permute.xlu1 %638 }
 0x321   : > { %v641_v42 = vmul.f32 %v1149_v27, %v639_v41 }
 0x323   : > { %643 = vrot.lane.b32.xlu0 %v641_v42, %s1474_s23 }
 0x395   : > { %v644_v43 = vpop.permute.xlu0 %643 }
 0x396   : > { %646 = vst.msk [vmem:[#allocation2] sm:$0xff] %vm458_vm3, %v644_v43  ;;  %1008 = vmatmul.mubr.msk.f32.vlgmr.msra.gmra.mrb[2].mxu1 %vm458_vm3, %v644_v43  ;;  %757 = vst.msk [vmem:[#allocation16] sm:$0xff] (!%p959_p13), %vm458_vm3, %v644_v43 }
 0x469   : > { %v731_v47 = vpop.f32.mrb[2].mxu1 }
 0x46a   : > { %v732_v48 = vadd.f32 %v957_v46, %v731_v47  ;;  %v1009_v49 = vpop.f32.mrb[3].mxu1 }
 0x46c   : > { %v738_v50 = vsel %vm737_vm4, %v732_v48, -inf }
 0x46d   : > { %739 = vmax.xlane.f32.xlu1 %v738_v50 }
 0x4fa   : > { %v740_v51 = vpop.xlane.xlu1 %739 }
 0x4fb   : > { %v741_v52 = vsub.f32 %v732_v48, %v740_v51 }
 0x4fd   : > { %v742_v53 = vsel %vm737_vm4, %v741_v52, -inf }
 0x4fe   : > { %v743_v54 = vmul.f32 1.442695, %v742_v53 }
 0x500   : > { %1152 = vpow2.f32 %v743_v54 }
 0x50a   : > { %v1153_v55 = vpop.eup %1152 }
 0x50b   : > { %745 = vadd.xlane.f32.xlu0 %v1153_v55 }
 0x521   : > { %648 = vrot.lane.b32.xlu0 %v635_v33, %s1475_s22 }
 0x598   : > { %v746_v56 = vpop.xlane.xlu0 %745 }
 0x599   : > { %1154 = vlog2.f32 %v746_v56 }
 0x59c   : > { %v649_v57 = vpop.permute.xlu0 %648 }
 0x59d   : > { %651 = vst.msk [vmem:[#allocation3] sm:$0xff] %vm458_vm3, %v649_v57  ;;  %758 = vst.msk [vmem:[#allocation18] sm:$0xff] (!%p959_p13), %vm458_vm3, %v649_v57 }
 0x5a3   : > { %v1155_v58 = vpop.eup %1154  ;;  %756 = sbr.rel (%p959_p13) target bundleno = 1450 (0x5aa), region = 84 }
 0x5a4   : > { %v748_v59 = vmul.f32 0.6931472, %v1155_v58 }
 0x5a6   : > { %v749_v60 = vadd.f32 %v748_v59, %v740_v51 }
 0x5a8   : > { %v751_v61 = vsel %vm750_vm5, %v749_v60, %v732_v48 }
 0x5a9   : > { %752 = vst [vmem:[%s1788_s20] sm:$0xff] %v751_v61 }
 0x5aa PF: > { %s1476_s26 = smov [#allocation16]   ;;  %s961_s28 = sshll.u32 %s1555_s19, 7 }
 0x5ab   : > { %s784_s25 = sshll.u32 %s1476_s26, 4  ;;  %s1811_s29 = scalar_lea.hbm %s1906_s8, %s961_s28  ;;  %s785_s25 = int_to_ptr.vmem [resolvable:$true] %s784_s25 }
 0x5ac   : > { %s1326_s30 = scalar_lea.vmem %s785_s25, 128  ;;  %p1939_p7 = scmp.eq.s32.totalorder %s1555_s19, 11 }
 0x5ad   : > { %p1327_p5 = scmp.ne.s32.totalorder %s785_s25, %s1326_s30  ;;  %p1333_p10 = scmp.lt.s32.totalorder %s785_s25, %s785_s25 }
 0x5ae   : > { %p1334_p1 = scmp.lt.s32.totalorder %s1326_s30, %s1326_s30 }
 0x5af   : > { %p1328_p3 = pnand %p1327_p5, %p1939_p7 }
 0x5b0   : > { %p1335_p6 = por %p1334_p1, %p1333_p10 }
 0x5b1   : > { %p1329_p4 = pneg %p1328_p3 }
 0x5b3   : > { %p1336_p0 = pnand %p1335_p6, %p1329_p4 }
 0x5b5   : > { %1339 = shalt.err (!%p1336_p0)
}
 0x5b6   : > { %s1340_s1 = scalar_lea.hbm %s1907_s9, 128  ;;  %p1940_p8 = pmov %p1939_p7 }
 0x5b7   : > { %p1341_p2 = scmp.ne.s32.totalorder %s1907_s9, %s1340_s1  ;;  %p1346_p11 = scmp.lt.u32.totalorder %s1340_s1, %s1907_s9 }
 0x5b9   : > { %p1342_p9 = pnand %p1341_p2, %p1940_p8 }
 0x5bb   : > { %p1343_p12 = pneg %p1342_p9 }
 0x5bd   : > { %p1348_p13 = pnand %p1346_p11, %p1343_p12 }
 0x5bf   : > { %1351 = shalt.err (!%p1348_p13)
}
 0x5c0   : > { %p1941_p5 = pmov %p1939_p7  ;;  %s773_s23 = sshll.u32 %s1788_s20, 4  ;;  %s1832_s23 = int_to_ptr.vmem [resolvable:$true] %s773_s23 }
 0x5c1   : > { %s1477_s17 = smov [#allocation18]   ;;  %s760_s1 = scalar_lea.sflag [#allocation6], %s1766_s2 }
 0x5c2   : > { %1049 = dma.vmem_to_hbm [thread:$0]  (%p1941_p5), %s785_s25, 128, %s1907_s9, [#allocation17]  }
 0x5c3   : > { %s1834_s22 = sshll.u32 %s1477_s17, 4  ;;  %s1352_s26 = scalar_lea.vmem %s1832_s23, 128  ;;  %s796_s22 = int_to_ptr.vmem [resolvable:$true] %s1834_s22 }
 0x5c4   : > { %p1353_p7 = scmp.ne.s32.totalorder %s1832_s23, %s1352_s26  ;;  %p1942_p3 = scmp.ne.s32.totalorder %s1928_s12, 0 }
 0x5c5   : > { %s1478_s28 = smov [#allocation15]  }
 0x5c6   : > { %p1354_p4 = pnand %p1353_p7, %p1942_p3  ;;  %s1356_s24 = sshll.u32 %s1478_s28, 4  ;;  %s1357_s24 = int_to_ptr.vmem [resolvable:$false] %s1356_s24 }
 0x5c7   : > { %s1358_s18 = scalar_lea.vmem %s1357_s24, 256  ;;  %p1359_p1 = scmp.lt.s32.totalorder %s1832_s23, %s1357_s24 }
 0x5c8   : > { %p1355_p10 = pneg %p1354_p4  ;;  %p1360_p6 = scmp.lt.s32.totalorder %s1358_s18, %s1352_s26 }
 0x5ca   : > { %p1361_p0 = por %p1360_p6, %p1359_p1 }
 0x5cc   : > { %p1362_p2 = pnand %p1361_p0, %p1355_p10 }
 0x5ce   : > { %1365 = shalt.err (!%p1362_p2)
}
 0x5cf   : > { %s1366_s2 = scalar_lea.hbm %s1811_s29, 128  ;;  %s1370_s30 = scalar_lea.hbm %s1906_s8, 1536 }
 0x5d0   : > { %p1367_p8 = scmp.ne.s32.totalorder %s1811_s29, %s1366_s2  ;;  %p1371_p11 = scmp.lt.u32.totalorder %s1811_s29, %s1906_s8 }
 0x5d1   : > { %p1372_p13 = scmp.lt.u32.totalorder %s1370_s30, %s1366_s2  ;;  %p1374_p7 = scmp.lt.u32.totalorder %s1366_s2, %s1811_s29 }
 0x5d2   : > { %p1368_p9 = pnand %p1367_p8, %p1942_p3 }
 0x5d3   : > { %p1373_p5 = por %p1372_p13, %p1371_p11 }
 0x5d4   : > { %p1369_p12 = pneg %p1368_p9 }
 0x5d5   : > { %p1375_p4 = por %p1374_p7, %p1373_p5 }
 0x5d7   : > { %p1376_p10 = pnand %p1375_p4, %p1369_p12 }
 0x5d9   : > { %1379 = shalt.err (!%p1376_p10)
}
 0x5da   : > { %1047 = dma.vmem_to_hbm [thread:$0]  (%p1942_p3), %s1832_s23, 128, %s1811_s29, %s760_s1  }
 0x5db   : > { %s1380_s26 = scalar_lea.vmem %s796_s22, 128  ;;  %p1943_p6 = scmp.eq.s32.totalorder %s1555_s19, 11 }
 0x5dc   : > { %p1381_p1 = scmp.ne.s32.totalorder %s796_s22, %s1380_s26  ;;  %p1387_p8 = scmp.lt.s32.totalorder %s796_s22, %s796_s22 }
 0x5dd   : > { %p1388_p9 = scmp.lt.s32.totalorder %s1380_s26, %s1380_s26 }
 0x5de   : > { %p1382_p0 = pnand %p1381_p1, %p1943_p6 }
 0x5df   : > { %p1389_p11 = por %p1388_p9, %p1387_p8 }
 0x5e0   : > { %p1383_p2 = pneg %p1382_p0 }
 0x5e2   : > { %p1390_p13 = pnand %p1389_p11, %p1383_p2 }
 0x5e4   : > { %1393 = shalt.err (!%p1390_p13)
}
 0x5e5   : > { %s1394_s12 = scalar_lea.hbm %s1908_s10, 128  ;;  %p1944_p12 = pmov %p1943_p6 }
 0x5e6   : > { %p1395_p3 = scmp.ne.s32.totalorder %s1908_s10, %s1394_s12  ;;  %p1400_p4 = scmp.lt.u32.totalorder %s1394_s12, %s1908_s10 }
 0x5e8   : > { %p1396_p5 = pnand %p1395_p3, %p1944_p12 }
 0x5ea   : > { %p1397_p7 = pneg %p1396_p5 }
 0x5ec   : > { %p1402_p10 = pnand %p1400_p4, %p1397_p7 }
 0x5ee   : > { %1405 = shalt.err (!%p1402_p10)
}
 0x5ef   : > { %p1945_p1 = pmov %p1943_p6 }
 0x5f1   : > { %1051 = dma.vmem_to_hbm [thread:$0]  (%p1945_p1), %s796_s22, 128, %s1908_s10, [#allocation17]  }
 0x5f2   : > { %p1946_p6 = pmov %p1945_p1 }
 0x5f3   : > { %p1947_p0 = pmov %p1945_p1 }
 0x5f4   : > { %1439 = dma.done.wait (%p1946_p6), [#allocation17], 256  }
 0x5f5   : > { %1441 = vsyncadd (%p1947_p0), [#allocation17], 4294967040 }
 0x5f6 PF: > { %p1096_p2 = scmp.ge.s32.totalorder %s1460_s16, 2  ;;  %s815_s30 = sand.u32 1, %s1448_s13  }
 0x5f7   : > { %p1948_p8 = scmp.ne.s32.totalorder %s1929_s27, 0  ;;  %s816_s17 = scalar_lea.sflag [#allocation6], %s815_s30 }
 0x5f9   : > { %p1078_p9 = pnand %p1096_p2, %p1948_p8 }
 0x5fb   : > { %1443 = dma.done.wait (!%p1078_p9), %s816_s17, 128  }
 0x5fc   : > { %1445 = vsyncadd (!%p1078_p9), %s816_s17, 4294967168  ;;  %p28_p11 = scmp.ge.s32.totalorder %s1694_s11, 14   ;;  %s1949_s13 = smov %s1452_s14 }
 0x5fd   : > { %s1950_s14 = smov %s1456_s15  ;;  %s1951_s15 = smov %s1706_s21 }
 0x5fe   : > { %s1952_s16 = smov %s1694_s11  ;;  %30 = sbr.rel (!%p28_p11) target bundleno = 12 (0xc), region = 141 }
 0x605   :  { %821 = vsyncpa [#allocation5], 1 }
 0x606   :  { %823 = vsyncpa [#allocation5 + $0x1], 1 }
 0x607   :  { %824 = vsyncpa [#allocation8], 1 }
 0x608   :  { %825 = vsyncpa [#allocation11], 1 }
 0x609   :  { %826 = vsyncpa [#allocation14], 1 }
 0x60a   :  { %827 = vsyncpa [#allocation6], 1 }
 0x60b   :  { %829 = vsyncpa [#allocation6 + $0x1], 1 }
 0x60c   :  { %830 = vsyncpa [#allocation17], 1 }

</bundles_post_ra>
